<compile_context>
chip_gen: v7x
topology: tpu7x:2x2x1
jax: 0.10.0
libtpu: 0.0.40
codegen_flags: <defaults>
</compile_context>

<pallas_src>
import jax
import jax.numpy as jnp
from jax.experimental import pallas as pl
from jax.experimental.pallas import tpu as pltpu  # noqa: F401  (TPU backend)

_LANE = 128      # lane width of a vreg
_SUBLANE = 8     # sublane count of a vreg (f32)


def _round_up(n, m):
    return ((n + m - 1) // m) * m


def _make_fused_kernel(n_branches):
    """Kernel over refs: (x_0, w_0, ..., x_{n-1}, w_{n-1}, bias, out).

    Each w_i is already [K_i_pad, N_pad] with that branch's output features
    placed in its own disjoint lane range (zeros elsewhere), so a simple sum of
    the per-branch matmuls plus the packed bias yields the packed output slab.
    """

    def kernel(*refs):
        b_ref = refs[2 * n_branches]
        o_ref = refs[2 * n_branches + 1]
        acc = None
        for i in range(n_branches):           # unrolled at trace time (2 MXU pushes)
            x = refs[2 * i][...]               # [B_pad, K_i_pad]
            w = refs[2 * i + 1][...]           # [K_i_pad, N_pad]  (already transposed)
            d = jnp.dot(x, w, preferred_element_type=jnp.float32)
            acc = d if acc is None else acc + d
        o_ref[...] = (acc + b_ref[...]).astype(o_ref.dtype)

    return kernel


def prepare_fused_branch_params(branch_params, dtype=jnp.float32):
    """One-time parameter packing (weights are static).

    branch_params: list of (w [out,in], b [out]) in PyTorch nn.Linear layout.
    Returns (w_packed, b_packed, out_slices, n_pad):
      w_packed[i] : [K_i_pad, N_pad]  = w_i.T placed in lanes [off_i, off_i+out_i)
      b_packed    : [1, N_pad]        = concatenated biases, zero padded
      out_slices  : [(offset, out_features)] per branch, for wrapper-side slicing
    """
    outs = [int(w.shape[0]) for w, _ in branch_params]
    offsets = [0]
    for o in outs:
        offsets.append(offsets[-1] + o)
    n_total = offsets[-1]
    n_pad = _round_up(max(n_total, 1), _LANE)

    w_packed = []
    for i, (w, _) in enumerate(branch_params):
        out_f, in_f = w.shape
        k_pad = _round_up(int(in_f), _SUBLANE)
        wt = jnp.zeros((k_pad, n_pad), dtype)
        wt = wt.at[:in_f, offsets[i]:offsets[i] + out_f].set(w.T.astype(dtype))
        w_packed.append(wt)

    b_packed = jnp.zeros((1, n_pad), dtype)
    for i, (_, b) in enumerate(branch_params):
        b_packed = b_packed.at[0, offsets[i]:offsets[i] + b.shape[0]].set(b.astype(dtype))

    out_slices = [(offsets[i], outs[i]) for i in range(len(outs))]
    return w_packed, b_packed, out_slices, n_pad


def fused_branch_forward(xs, w_packed, b_packed, out_slices, n_pad):
    """Equivalent of Branch.forward: apply branch i to xs[i], return a tuple.

    Single fused Pallas kernel launch; outputs are sliced from one lane-dense slab.
    """
    n_branches = len(xs)
    assert n_branches == len(w_packed)
    batch = xs[0].shape[0]
    dtype = w_packed[0].dtype
    b_pad = _round_up(max(batch, 1), _SUBLANE)

    # Zero-pad each input to [B_pad, K_i_pad] (padding rows/cols contribute nothing).
    args = []
    in_specs = []
    for x, wp in zip(xs, w_packed):
        k_pad = wp.shape[0]
        xp = jnp.zeros((b_pad, k_pad), dtype)
        xp = xp.at[:x.shape[0], :x.shape[1]].set(x.astype(dtype))
        args.append(xp)
        args.append(wp)
        in_specs.append(pl.BlockSpec((b_pad, k_pad), lambda: (0, 0)))
        in_specs.append(pl.BlockSpec(wp.shape, lambda: (0, 0)))
    args.append(b_packed)
    in_specs.append(pl.BlockSpec(b_packed.shape, lambda: (0, 0)))

    itemsize = jnp.dtype(dtype).itemsize
    flops = sum(2 * b_pad * wp.shape[0] * wp.shape[1] for wp in w_packed)
    bytes_accessed = (
        sum(a.size * itemsize for a in args) + b_pad * n_pad * itemsize
    )

    out_slab = pl.pallas_call(
        _make_fused_kernel(n_branches),
        out_shape=jax.ShapeDtypeStruct((b_pad, n_pad), dtype),
        # Tiny shapes: whole arrays as single blocks, no grid, no pipelining.
        in_specs=in_specs,
        out_specs=pl.BlockSpec((b_pad, n_pad), lambda: (0, 0)),
        cost_estimate=pl.CostEstimate(
            flops=flops, transcendentals=0, bytes_accessed=bytes_accessed
        ),
    )(*args)

    return tuple(out_slab[:batch, off:off + n] for off, n in out_slices)


if __name__ == "__main__":
    key = jax.random.PRNGKey(0)
    k_x0, k_x1, k_w0, k_b0, k_w1, k_b1 = jax.random.split(key, 6)

    batch = 2
    # Branch 0: Linear(32 -> 16); Branch 1: Linear(24 -> 8)
    in0, out0 = 32, 16
    in1, out1 = 24, 8

    x0 = jax.random.normal(k_x0, (batch, in0), dtype=jnp.float32)
    x1 = jax.random.normal(k_x1, (batch, in1), dtype=jnp.float32)

    # Deterministic synthetic parameters (PyTorch nn.Linear-shaped: [out, in], [out]).
    w0 = jax.random.normal(k_w0, (out0, in0), dtype=jnp.float32) * 0.1
    b0 = jax.random.normal(k_b0, (out0,), dtype=jnp.float32) * 0.1
    w1 = jax.random.normal(k_w1, (out1, in1), dtype=jnp.float32) * 0.1
    b1 = jax.random.normal(k_b1, (out1,), dtype=jnp.float32) * 0.1

    branch_params = [(w0, b0), (w1, b1)]
    xs = (x0, x1)

    # One-time parameter packing (pre-transpose + lane/sublane padding).
    w_packed, b_packed, out_slices, n_pad = prepare_fused_branch_params(branch_params)

    outs = fused_branch_forward(xs, w_packed, b_packed, out_slices, n_pad)
    outs = jax.block_until_ready(outs)

    # Reference check against plain JAX (same semantics as PyTorch Linear).
    ref0 = x0 @ w0.T + b0
    ref1 = x1 @ w1.T + b1
    assert outs[0].shape == (batch, out0) and outs[1].shape == (batch, out1)
    assert jnp.allclose(outs[0], ref0, atol=1e-5, rtol=1e-5)
    assert jnp.allclose(outs[1], ref1, atol=1e-5, rtol=1e-5)

    print("KERNEL_OK")
</pallas_src>

<mosaic_0001>
module attributes {stable_mosaic.version = 11 : i64} {
  func.func @kernel(%arg0: memref<8x32xf32, #tpu.memory_space<vmem>>, %arg1: memref<32x128xf32, #tpu.memory_space<vmem>>, %arg2: memref<8x24xf32, #tpu.memory_space<vmem>>, %arg3: memref<24x128xf32, #tpu.memory_space<vmem>>, %arg4: memref<1x128xf32, #tpu.memory_space<vmem>>, %arg5: memref<8x128xf32, #tpu.memory_space<vmem>>) attributes {dimension_semantics = [], scalar_prefetch = 0 : i64, scratch_operands = 0 : i64, tpu.core_type = #tpu.core_type<tc>} {
    %c0 = arith.constant 0 : index
    %c0_0 = arith.constant 0 : index
    %0 = vector.load %arg0[%c0, %c0_0] : memref<8x32xf32, #tpu.memory_space<vmem>>, vector<8x32xf32>
    %c0_1 = arith.constant 0 : index
    %c0_2 = arith.constant 0 : index
    %1 = vector.load %arg1[%c0_1, %c0_2] : memref<32x128xf32, #tpu.memory_space<vmem>>, vector<32x128xf32>
    %cst = arith.constant dense<0.000000e+00> : vector<8x128xf32>
    %2 = tpu.matmul %0, %1, %cst {dimension_numbers = #tpu.dot_dimension_numbers<[1], [0], [0], [1], [0, 0, 1, 1], [], []>} : vector<8x32xf32>, vector<32x128xf32>, vector<8x128xf32> -> vector<8x128xf32>
    %c0_3 = arith.constant 0 : index
    %c0_4 = arith.constant 0 : index
    %3 = vector.load %arg2[%c0_3, %c0_4] : memref<8x24xf32, #tpu.memory_space<vmem>>, vector<8x24xf32>
    %c0_5 = arith.constant 0 : index
    %c0_6 = arith.constant 0 : index
    %4 = vector.load %arg3[%c0_5, %c0_6] : memref<24x128xf32, #tpu.memory_space<vmem>>, vector<24x128xf32>
    %cst_7 = arith.constant dense<0.000000e+00> : vector<8x128xf32>
    %5 = tpu.matmul %3, %4, %cst_7 {dimension_numbers = #tpu.dot_dimension_numbers<[1], [0], [0], [1], [0, 0, 1, 1], [], []>} : vector<8x24xf32>, vector<24x128xf32>, vector<8x128xf32> -> vector<8x128xf32>
    %6 = arith.addf %2, %5 : vector<8x128xf32>
    %c0_8 = arith.constant 0 : index
    %c0_9 = arith.constant 0 : index
    %7 = vector.load %arg4[%c0_8, %c0_9] : memref<1x128xf32, #tpu.memory_space<vmem>>, vector<1x128xf32>
    %8 = vector.broadcast %7 : vector<1x128xf32> to vector<8x128xf32>
    %9 = arith.addf %6, %8 : vector<8x128xf32>
    %c0_10 = arith.constant 0 : index
    %c0_11 = arith.constant 0 : index
    %10 = vector.load %arg5[%c0_10, %c0_11] : memref<8x128xf32, #tpu.memory_space<vmem>>, vector<8x128xf32>
    tpu.vector_store %arg5[%c0_10, %c0_11], %9 {strides = array<i32>} : memref<8x128xf32, #tpu.memory_space<vmem>>, vector<8x128xf32>,
    return
  }
}

</mosaic_0001>

<bundles_post_ra>
// kernel: tpu_custom_call.1
= control target key start
LH: loop header
LB: loop body
LE: loop exit
PB: predicated region body
PF: predicated region fallthrough
CT: control target
= control target key end

     0   :  { %10 = vsyncpa [#allocation3], 0  ;;  %s533_s0 = inlined_call_operand.hbm [shape: f32[8,32], index: 0, kind: input, shape index: {}]   ;;  %s534_s1 = inlined_call_operand.hbm [shape: f32[32,128], index: 1, kind: input, shape index: {}]   ;;  %s535_s2 = inlined_call_operand.hbm [shape: f32[8,24], index: 2, kind: input, shape index: {}]   ;;  %s536_s3 = inlined_call_operand.hbm [shape: f32[24,128], index: 3, kind: input, shape index: {}]   ;;  %s537_s4 = inlined_call_operand.vmem [shape: f32[1,128], index: 4, kind: input, shape index: {}]   ;;  %s538_s5 = inlined_call_operand.hbm [shape: f32[8,128], index: 5, kind: output, shape index: {}]  }
   0x1   :  { %11 = vsyncpa [#allocation6], 0 }
   0x2   :  { %12 = vsyncpa [#allocation9], 0 }
   0x3   :  { %13 = vsyncpa [#allocation4], 0  ;;  %s424_s18 = smov [#allocation5]   ;;  %s306_s22 = scalar_lea.hbm %s534_s1, 512 }
   0x4   :  { %s29_s19 = sshll.u32 %s424_s18, 4  ;;  %p307_p0 = scmp.ne.s32.totalorder %s534_s1, %s306_s22  ;;  %s30_s19 = int_to_ptr.vmem [resolvable:$true] %s29_s19 }
   0x5   :  { %p310_p1 = scmp.lt.u32.totalorder %s306_s22, %s534_s1 }
   0x7   :  { %p312_p2 = pnand %p310_p1, %p307_p0 }
   0x9   :  { %315 = shalt.err (!%p312_p2)
}
   0xa   :  { %s316_s27 = scalar_lea.vmem %s30_s19, 512  ;;  %p321_p4 = scmp.lt.s32.totalorder %s30_s19, %s30_s19 }
   0xb   :  { %p317_p3 = scmp.ne.s32.totalorder %s30_s19, %s316_s27  ;;  %p322_p5 = scmp.lt.s32.totalorder %s316_s27, %s316_s27 }
   0xd   :  { %p323_p6 = por %p322_p5, %p321_p4 }
   0xf   :  { %p324_p7 = pnand %p323_p6, %p317_p3 }
  0x11   :  { %327 = shalt.err (!%p324_p7)
}
  0x12   :  { %s425_s28 = smov 128   ;;  %s426_s29 = smov 8  }
  0x13   :  { %35 = dma.hbm_to_vmem [thread:$0]  %s534_s1, 512, %s30_s19, [#allocation6], %s425_s28, %s425_s28, %s426_s29  }
  0x14   :  { %s427_s7 = smov [#allocation2]   ;;  %s428_s9 = smov [#allocation7]  }
  0x15   :  { %s20_s8 = sshll.u32 %s427_s7, 4  ;;  %s42_s10 = sshll.u32 %s428_s9, 4  ;;  %s21_s8 = int_to_ptr.vmem [resolvable:$true] %s20_s8  ;;  %s43_s10 = int_to_ptr.vmem [resolvable:$true] %s42_s10 }
  0x16   :  { %s328_s13 = scalar_lea.hbm %s533_s0, 128 }
  0x17   :  { %p329_p8 = scmp.ne.s32.totalorder %s533_s0, %s328_s13  ;;  %p332_p9 = scmp.lt.u32.totalorder %s328_s13, %s533_s0 }
  0x19   :  { %p334_p10 = pnand %p332_p9, %p329_p8 }
  0x1b   :  { %337 = shalt.err (!%p334_p10)
}
  0x1c   :  { %s338_s1 = scalar_lea.vmem %s21_s8, 128  ;;  %p343_p12 = scmp.lt.s32.totalorder %s21_s8, %s21_s8 }
  0x1d   :  { %p339_p11 = scmp.ne.s32.totalorder %s21_s8, %s338_s1  ;;  %p344_p13 = scmp.lt.s32.totalorder %s338_s1, %s338_s1 }
  0x1f   :  { %p345_p0 = por %p344_p13, %p343_p12 }
  0x21   :  { %p346_p1 = pnand %p345_p0, %p339_p11 }
  0x23   :  { %349 = shalt.err (!%p346_p1)
}
  0x24   :  { %23 = dma.hbm_to_vmem [thread:$0]  %s533_s0, 128, %s21_s8, [#allocation3]  }
  0x25   :  { %s350_s22 = scalar_lea.hbm %s535_s2, 128 }
  0x26   :  { %p351_p2 = scmp.ne.s32.totalorder %s535_s2, %s350_s22  ;;  %p354_p3 = scmp.lt.u32.totalorder %s350_s22, %s535_s2 }
  0x28   :  { %p356_p4 = pnand %p354_p3, %p351_p2 }
  0x2a   :  { %359 = shalt.err (!%p356_p4)
}
  0x2b   :  { %s360_s27 = scalar_lea.vmem %s43_s10, 128  ;;  %p365_p6 = scmp.lt.s32.totalorder %s43_s10, %s43_s10 }
  0x2c   :  { %p361_p5 = scmp.ne.s32.totalorder %s43_s10, %s360_s27  ;;  %p366_p7 = scmp.lt.s32.totalorder %s360_s27, %s360_s27 }
  0x2e   :  { %p367_p8 = por %p366_p7, %p365_p6 }
  0x30   :  { %p368_p9 = pnand %p367_p8, %p361_p5 }
  0x32   :  { %371 = shalt.err (!%p368_p9)
}
  0x33   :  { %45 = dma.hbm_to_vmem [thread:$0]  %s535_s2, 128, %s43_s10, [#allocation6]  }
  0x34   :  { %s429_s6 = smov [#allocation8]   ;;  %s372_s11 = scalar_lea.hbm %s536_s3, 384 }
  0x35   :  { %s51_s7 = sshll.u32 %s429_s6, 4  ;;  %p373_p10 = scmp.ne.s32.totalorder %s536_s3, %s372_s11  ;;  %s52_s7 = int_to_ptr.vmem [resolvable:$true] %s51_s7 }
  0x36   :  { %p376_p11 = scmp.lt.u32.totalorder %s372_s11, %s536_s3 }
  0x38   :  { %p378_p12 = pnand %p376_p11, %p373_p10 }
  0x3a   :  { %381 = shalt.err (!%p378_p12)
}
  0x3b   :  { %s382_s16 = scalar_lea.vmem %s52_s7, 384  ;;  %p387_p0 = scmp.lt.s32.totalorder %s52_s7, %s52_s7 }
  0x3c   :  { %p383_p13 = scmp.ne.s32.totalorder %s52_s7, %s382_s16  ;;  %p388_p1 = scmp.lt.s32.totalorder %s382_s16, %s382_s16 }
  0x3e   :  { %p389_p2 = por %p388_p1, %p387_p0 }
  0x40   :  { %p390_p3 = pnand %p389_p2, %p383_p13 }
  0x42   :  { %393 = shalt.err (!%p390_p3)
}
  0x43   :  { %57 = dma.hbm_to_vmem [thread:$0]  %s536_s3, 384, %s52_s7, [#allocation9], %s425_s28, %s425_s28, %s426_s29  }
  0x44   :  { %416 = dma.done.wait [#allocation3], 128  }
  0x45   :  { %417 = vsyncadd [#allocation3], 4294967168 }
  0x46   :  { %418 = dma.done.wait [#allocation6], 640  }
  0x47   :  { %419 = vsyncadd [#allocation6], 4294966656 }
  0x48   :  { %420 = dma.done.wait [#allocation9], 384  }
  0x49   :  { %421 = vsyncadd [#allocation9], 4294966912  ;;  %v430_v0 = vmov 0.0|0.0   ;;  %vm431_vm0 = vmmov 0   ;;  %v432_v1 = vmov 0.0   ;;  %v73_v2 = vld [vmem:[#allocation5] sm:$0xff] }
  0x4a   :  { %290 = vmatprep.subr.bf16.mxu1 %v430_v0  ;;  %287 = vmatprep.subr.bf16.mxu0 %v430_v0  ;;  %v74_v3 = vld [vmem:[#allocation5 + $0x8] sm:$0xff]  ;;  %v79_v6 = vld [vmem:[#allocation8 + $0x8] sm:$0xff]  ;;  %v76_v8 = vld [vmem:[#allocation5 + $0x18] sm:$0xff]  ;;  %vm81_vm1 = vcmask 195584   ;;  %vm155_vm2 = vcmask 261120   ;;  %s433_s29 = smov [#allocation10]  }
  0x4b   :  { %273 = vmatprep.mubr.msk.f32.mxu0 %vm431_vm0, %v432_v1  ;;  %284 = vmatprep.mubr.msk.f32.mxu1 %vm431_vm0, %v432_v1  ;;  %v78_v4 = vld [vmem:[#allocation8] sm:$0xff]  ;;  %v291_v5 = vpack.c.bf16 %v74_v3, %v73_v2  ;;  %v75_v7 = vld [vmem:[#allocation5 + $0x10] sm:$0xff]  ;;  %v80_v11 = vld [vmem:[#allocation8 + $0x10] sm:$0xff]  ;;  %s244_s17 = sshll.u32 %s433_s29, 4  ;;  %s245_s17 = int_to_ptr.vmem [resolvable:$true] %s244_s17 }
  0x4c   :  { %v288_v9 = vpack.c.bf16 %v79_v6, %v78_v4  ;;  %v294_v10 = vpack.c.bf16 %v76_v8, %v75_v7  ;;  %v77_v12 = vld [vmem:[#allocation7] sm:$0xff]  ;;  %v72_v13 = vld [vmem:[#allocation2] sm:$0xff]  ;;  %s394_s1 = scalar_lea.vmem %s245_s17, 128  ;;  %p399_p5 = scmp.lt.s32.totalorder %s245_s17, %s245_s17 }
  0x4d   :  { %292 = vmatpush3.bf16.msra.mxu1 %v291_v5  ;;  %v257_v17 = vld [vmem:[%s537_s4] ss:$0 sm:$0xff]  ;;  %p395_p4 = scmp.ne.s32.totalorder %s245_s17, %s394_s1  ;;  %p400_p6 = scmp.lt.s32.totalorder %s394_s1, %s394_s1 }
  0x4e   :  { %289 = vmatpush3.bf16.msra.mxu0 %v288_v9  ;;  %293 = vmatprep.subr.bf16.mxu1 %v430_v0 }
  0x4f   :  { %271 = vmatprep.subr.mxu0 %v432_v1  ;;  %p401_p7 = por %p400_p6, %p399_p5 }
  0x51   :  { %295 = vmatpush3.bf16.msra.mxu1 %v294_v10  ;;  %p402_p8 = pnand %p401_p7, %p395_p4 }
  0x52   :  { %272 = vmatpush3.msra.mxu0 %v80_v11 }
  0x53   :  { %274 = vmatmul.mubr.msk.f32.vlgmr.msra.gmra.mrb[0].mxu0 %vm81_vm1, %v77_v12 }
  0x54   :  { %285 = vmatmul.mubr.msk.f32.vlgmr.msra.gmra.mrb[0].mxu1 %vm155_vm2, %v72_v13 }
 0x126   :  { %v151_v14 = vpop.f32.mrb[0].mxu0 }
 0x127   :  { %v275_v15 = vpop.f32.mrb[1].mxu0  ;;  %v225_v16 = vpop.f32.mrb[0].mxu1 }
 0x128   :  { %v226_v18 = vadd.f32 %v225_v16, %v151_v14  ;;  %v286_v19 = vpop.f32.mrb[1].mxu1 }
 0x12a   :  { %v236_v20 = vadd.f32 %v257_v17, %v226_v18 }
 0x12c   :  { %237 = vst [vmem:[#allocation10] sm:$0xff] %v236_v20 }
 0x12d   :  { %405 = shalt.err (!%p402_p8)
}
 0x12e   :  { %s406_s20 = scalar_lea.hbm %s538_s5, 128 }
 0x12f   :  { %p407_p9 = scmp.ne.s32.totalorder %s538_s5, %s406_s20  ;;  %p410_p10 = scmp.lt.u32.totalorder %s406_s20, %s538_s5 }
 0x131   :  { %p412_p11 = pnand %p410_p10, %p407_p9 }
 0x133   :  { %415 = shalt.err (!%p412_p11)
}
 0x134   :  { %247 = dma.vmem_to_hbm [thread:$0]  %s245_s17, 128, %s538_s5, [#allocation4]  }
 0x135   :  { %422 = dma.done.wait [#allocation4], 128  }
 0x136   :  { %423 = vsyncadd [#allocation4], 4294967168 }
 0x137   :  { %251 = vsyncpa [#allocation3], 1 }
 0x138   :  { %252 = vsyncpa [#allocation6], 1 }
 0x139   :  { %253 = vsyncpa [#allocation9], 1 }
 0x13a   :  { %254 = vsyncpa [#allocation4], 1 }

</bundles_post_ra>
